<compile_context>
chip_gen: v7x
topology: tpu7x:2x2x1
jax: 0.10.0
libtpu: 0.0.40
codegen_flags: <defaults>
</compile_context>

<pallas_src>
import functools

import jax
import jax.numpy as jnp
from jax.experimental import pallas as pl
from jax.experimental.pallas import tpu as pltpu

LN_EPS = 1e-5  # nn.LayerNorm default


def _msa_kernel(x_ref, gamma_ref, beta_ref, wqkv_ref, bqkv_ref, wo_ref, bo_ref,
                o_ref, q_sc, k_sc, v_sc, *, num_heads, q_chunk):
    H = num_heads
    S = x_ref.shape[1]
    E = x_ref.shape[2]
    D = E // H
    TQ = q_chunk
    qi = pl.program_id(1)

    # ---- Once per batch element: LayerNorm + fused QKV projection into VMEM scratch ----
    @pl.when(qi == 0)
    def _():
        x = x_ref[0].astype(jnp.float32)                           # (S, E)
        mean = jnp.mean(x, axis=-1, keepdims=True)
        var = jnp.mean(jnp.square(x - mean), axis=-1, keepdims=True)
        y = (x - mean) * jax.lax.rsqrt(var + LN_EPS)
        y = y * gamma_ref[...] + beta_ref[...]                     # f32 stats + affine

        # One lane-dense matmul (M=S, K=E, N=3E); 1/sqrt(D) already folded into q columns.
        qkv = jnp.dot(y.astype(jnp.bfloat16), wqkv_ref[...],
                      preferred_element_type=jnp.float32) + bqkv_ref[...]   # (S, 3E) f32

        # Head-major relayout into persistent scratch (pure data movement, once per batch).
        for h in range(H):
            q_sc[h, :, :] = qkv[:, h * D:(h + 1) * D].astype(jnp.bfloat16)
            k_sc[h, :, :] = qkv[:, E + h * D:E + (h + 1) * D].astype(jnp.bfloat16)
            v_sc[h, :, :] = qkv[:, 2 * E + h * D:2 * E + (h + 1) * D].astype(jnp.bfloat16)

    # ---- Per query chunk: attention (f32 softmax stats) + full-depth output projection ----
    start = pl.multiple_of(qi * TQ, TQ)
    qc = q_sc[:, pl.ds(start, TQ), :]                              # (H, TQ, D) bf16 (pre-scaled)
    k_all = k_sc[...]                                              # (H, S, D)  bf16
    v_all = v_sc[...]                                              # (H, S, D)  bf16

    s = jnp.einsum("hqd,hkd->hqk", qc, k_all,
                   preferred_element_type=jnp.float32)             # (H, TQ, S) f32
    s = s - jnp.max(s, axis=-1, keepdims=True)
    p = jnp.exp(s)
    l = jnp.sum(p, axis=-1, keepdims=True)                         # (H, TQ, 1)
    pv = jnp.einsum("hqk,hkd->hqd", p.astype(jnp.bfloat16), v_all,
                    preferred_element_type=jnp.float32)            # (H, TQ, D)
    # Normalize AFTER PV: only H*TQ*D multiplies; reciprocal on the EUP slot.
    attn = pv * pl.reciprocal(l, approx=True)                      # (H, TQ, D) f32

    # Heads -> lane-dense (TQ, E), then one (TQ,E) x (E,E) matmul with K=E.
    cat = jnp.concatenate([attn[h] for h in range(H)], axis=-1)    # (TQ, E) f32
    out = jnp.dot(cat.astype(jnp.bfloat16), wo_ref[...],
                  preferred_element_type=jnp.float32) + bo_ref[...]
    o_ref[0, :, :] = out.astype(o_ref.dtype)


def _vmem_limit_bytes():
    cap = 128 * 1024 * 1024
    try:  # hardware-info query only; kernel build itself is never guarded.
        cap = int(getattr(pltpu.get_tpu_info(), "vmem_capacity_bytes", cap))
    except Exception:
        pass
    # ~25% headroom for compiler scratch + pipelined in/out buffers (v7x -> ~48 MiB).
    return max(32 * 1024 * 1024, min(int(cap * 0.75), 100 * 1024 * 1024))


def _pick_q_chunk(S, H, budget_bytes):
    # Largest TQ (divisor of S; multiple of 8 or == S) whose f32 (H,TQ,S) score+prob
    # tiles fit the budget.
    cands = [c for c in range(S, 0, -1) if S % c == 0 and (c % 8 == 0 or c == S)]
    for c in cands:
        if 2 * H * c * S * 4 <= budget_bytes:
            return c
    return cands[-1]


def msa_block(x, params, *, num_heads):
    """x: (B, S, E) float32. params: LayerNorm + MHA weights in PyTorch conventions."""
    B, S, E = x.shape
    H = num_heads
    assert E % H == 0, "embedding_dim must be divisible by num_heads"
    D = E // H

    gamma = params["ln_gamma"].reshape(1, E).astype(jnp.float32)
    beta = params["ln_beta"].reshape(1, E).astype(jnp.float32)

    # Fold 1/sqrt(D) into the q rows of in_proj (weight folding, done once on host/XLA side).
    scale = 1.0 / (D ** 0.5)
    q_scale = jnp.concatenate([jnp.full((E,), scale, jnp.float32),
                               jnp.ones((2 * E,), jnp.float32)])
    w_in = params["in_proj_weight"].astype(jnp.float32) * q_scale[:, None]   # (3E, E)
    b_in = params["in_proj_bias"].astype(jnp.float32) * q_scale              # (3E,)
    w_qkv = w_in.T.astype(jnp.bfloat16)                                      # (E, 3E)
    b_qkv = b_in.reshape(1, 3 * E)                                           # (1, 3E) f32
    w_o = params["out_proj_weight"].astype(jnp.float32).T.astype(jnp.bfloat16)  # (E, E)
    b_o = params["out_proj_bias"].reshape(1, E).astype(jnp.float32)

    vmem_limit = _vmem_limit_bytes()
    q_chunk = _pick_q_chunk(S, H, vmem_limit // 3)
    n_q = S // q_chunk

    kernel = functools.partial(_msa_kernel, num_heads=H, q_chunk=q_chunk)

    flops = 2 * B * S * E * 3 * E + 4 * B * S * S * E + 2 * B * S * E * E
    cost = pl.CostEstimate(
        flops=int(flops),
        transcendentals=int(B * H * S * S),
        bytes_accessed=int(2 * B * S * E * 4 + (w_qkv.size + w_o.size) * 2
                           + (b_qkv.size + b_o.size + 2 * E) * 4),
    )

    grid_spec = pltpu.PrefetchScalarGridSpec(
        num_scalar_prefetch=0,
        grid=(B, n_q),
        in_specs=[
            pl.BlockSpec((1, S, E), lambda b, q: (b, 0, 0)),   # x (stays resident across q axis)
            pl.BlockSpec((1, E), lambda b, q: (0, 0)),         # LN gamma
            pl.BlockSpec((1, E), lambda b, q: (0, 0)),         # LN beta
            pl.BlockSpec((E, 3 * E), lambda b, q: (0, 0)),     # fused in_proj weight (E, 3E)
            pl.BlockSpec((1, 3 * E), lambda b, q: (0, 0)),     # fused in_proj bias (lane-dense)
            pl.BlockSpec((E, E), lambda b, q: (0, 0)),         # out_proj weight (E, E)
            pl.BlockSpec((1, E), lambda b, q: (0, 0)),         # out_proj bias
        ],
        out_specs=pl.BlockSpec((1, q_chunk, E), lambda b, q: (b, q, 0)),
        scratch_shapes=[
            pltpu.VMEM((H, S, D), jnp.bfloat16),   # Q (pre-scaled), persists across q chunks
            pltpu.VMEM((H, S, D), jnp.bfloat16),   # K
            pltpu.VMEM((H, S, D), jnp.bfloat16),   # V
        ],
    )

    return pl.pallas_call(
        kernel,
        out_shape=jax.ShapeDtypeStruct((B, S, E), x.dtype),
        grid_spec=grid_spec,
        compiler_params=pltpu.CompilerParams(
            dimension_semantics=("parallel", "arbitrary"),
            vmem_limit_bytes=vmem_limit,
        ),
        cost_estimate=cost,
    )(x, gamma, beta, w_qkv, b_qkv, w_o, b_o)


def _reference(x, params, *, num_heads):
    """Pure-JAX f32 reference matching PyTorch LayerNorm + nn.MultiheadAttention."""
    B, S, E = x.shape
    D = E // num_heads
    mean = jnp.mean(x, axis=-1, keepdims=True)
    var = jnp.mean(jnp.square(x - mean), axis=-1, keepdims=True)
    y = (x - mean) / jnp.sqrt(var + LN_EPS) * params["ln_gamma"] + params["ln_beta"]
    qkv = jnp.einsum("bse,fe->bsf", y, params["in_proj_weight"]) + params["in_proj_bias"]
    q, k, v = qkv[..., :E], qkv[..., E:2 * E], qkv[..., 2 * E:]
    q = q.reshape(B, S, num_heads, D).transpose(0, 2, 1, 3) / jnp.sqrt(D)
    k = k.reshape(B, S, num_heads, D).transpose(0, 2, 1, 3)
    v = v.reshape(B, S, num_heads, D).transpose(0, 2, 1, 3)
    s = jnp.einsum("bhqd,bhkd->bhqk", q, k)
    p = jax.nn.softmax(s, axis=-1)
    o = jnp.einsum("bhqk,bhkd->bhqd", p, v).transpose(0, 2, 1, 3).reshape(B, S, E)
    return jnp.einsum("bse,fe->bsf", o, params["out_proj_weight"]) + params["out_proj_bias"]


def make_params(key, embedding_dim):
    E = embedding_dim
    ks = jax.random.split(key, 4)
    return {
        "ln_gamma": jnp.ones((E,), jnp.float32),
        "ln_beta": jnp.zeros((E,), jnp.float32),
        "in_proj_weight": 0.05 * jax.random.normal(ks[0], (3 * E, E), jnp.float32),
        "in_proj_bias": 0.01 * jax.random.normal(ks[1], (3 * E,), jnp.float32),
        "out_proj_weight": 0.05 * jax.random.normal(ks[2], (E, E), jnp.float32),
        "out_proj_bias": 0.01 * jax.random.normal(ks[3], (E,), jnp.float32),
    }


if __name__ == "__main__":
    B, S, E, H = 2, 8, 32, 4   # small shapes; E divisible by num_heads
    key = jax.random.PRNGKey(0)
    kx, kp = jax.random.split(key)
    x = jax.random.normal(kx, (B, S, E), jnp.float32)
    params = make_params(kp, E)

    out = jax.block_until_ready(msa_block(x, params, num_heads=H))

    ref = _reference(x, params, num_heads=H)
    assert out.shape == (B, S, E)
    max_err = float(jnp.max(jnp.abs(out - ref)))
    # bf16 matmul inputs + approx reciprocal loosen the f32 tolerance slightly.
    assert max_err < 2e-2, f"mismatch vs reference: max abs err {max_err}"
    print("KERNEL_OK")
</pallas_src>

<mosaic_0001>
module attributes {stable_mosaic.version = 11 : i64} {
  func.func @_msa_kernel(%arg0: i32, %arg1: i32, %arg2: memref<1x8x32xf32, #tpu.memory_space<vmem>>, %arg3: memref<1x32xf32, #tpu.memory_space<vmem>>, %arg4: memref<1x32xf32, #tpu.memory_space<vmem>>, %arg5: memref<32x96xbf16, #tpu.memory_space<vmem>>, %arg6: memref<1x96xf32, #tpu.memory_space<vmem>>, %arg7: memref<32x32xbf16, #tpu.memory_space<vmem>>, %arg8: memref<1x32xf32, #tpu.memory_space<vmem>>, %arg9: memref<1x8x32xf32, #tpu.memory_space<vmem>>, %arg10: memref<4x8x8xbf16, #tpu.memory_space<vmem>>, %arg11: memref<4x8x8xbf16, #tpu.memory_space<vmem>>, %arg12: memref<4x8x8xbf16, #tpu.memory_space<vmem>>) attributes {dimension_semantics = [#tpu.dimension_semantics<parallel>, #tpu.dimension_semantics<arbitrary>], iteration_bounds = array<i64: 2, 1>, scalar_prefetch = 0 : i64, scratch_operands = 3 : i64, tpu.core_type = #tpu.core_type<tc>, window_params = [{transform_indices = @transform_0, window_bounds = array<i64: 1, 8, 32>}, {pipeline_mode = #tpu.pipeline_mode<synchronous>, transform_indices = @transform_1, window_bounds = array<i64: 1, 32>}, {pipeline_mode = #tpu.pipeline_mode<synchronous>, transform_indices = @transform_2, window_bounds = array<i64: 1, 32>}, {pipeline_mode = #tpu.pipeline_mode<synchronous>, transform_indices = @transform_3, window_bounds = array<i64: 32, 96>}, {pipeline_mode = #tpu.pipeline_mode<synchronous>, transform_indices = @transform_4, window_bounds = array<i64: 1, 96>}, {pipeline_mode = #tpu.pipeline_mode<synchronous>, transform_indices = @transform_5, window_bounds = array<i64: 32, 32>}, {pipeline_mode = #tpu.pipeline_mode<synchronous>, transform_indices = @transform_6, window_bounds = array<i64: 1, 32>}, {transform_indices = @transform_7, window_bounds = array<i64: 1, 8, 32>}]} {
    %c0_i32 = arith.constant 0 : i32
    %0 = arith.cmpi eq, %arg1, %c0_i32 : i32
    %1 = arith.extui %0 : i1 to i32
    %c0_i32_0 = arith.constant 0 : i32
    %2 = arith.cmpi ne, %1, %c0_i32_0 : i32
    scf.if %2 {
      %c0_19 = arith.constant 0 : index
      %c0_20 = arith.constant 0 : index
      %c0_21 = arith.constant 0 : index
      %40 = vector.load %arg2[%c0_19, %c0_20, %c0_21] : memref<1x8x32xf32, #tpu.memory_space<vmem>>, vector<1x8x32xf32>
      %41 = vector.shape_cast %40 : vector<1x8x32xf32> to vector<8x32xf32>
      %cst_22 = arith.constant dense<0.000000e+00> : vector<8xf32>
      %42 = vector.multi_reduction <add>, %41, %cst_22 [1] : vector<8x32xf32> to vector<8xf32>
      %43 = vector.shape_cast %42 : vector<8xf32> to vector<8x1xf32>
      %cst_23 = arith.constant 3.200000e+01 : f32
      %44 = vector.broadcast %cst_23 : f32 to vector<8x1xf32>
      %45 = arith.divf %43, %44 : vector<8x1xf32>
      %46 = vector.broadcast %45 : vector<8x1xf32> to vector<8x32xf32>
      %47 = arith.subf %41, %46 : vector<8x32xf32>
      %48 = arith.mulf %47, %47 : vector<8x32xf32>
      %cst_24 = arith.constant dense<0.000000e+00> : vector<8xf32>
      %49 = vector.multi_reduction <add>, %48, %cst_24 [1] : vector<8x32xf32> to vector<8xf32>
      %50 = vector.shape_cast %49 : vector<8xf32> to vector<8x1xf32>
      %cst_25 = arith.constant 3.200000e+01 : f32
      %51 = vector.broadcast %cst_25 : f32 to vector<8x1xf32>
      %52 = arith.divf %50, %51 : vector<8x1xf32>
      %53 = vector.broadcast %45 : vector<8x1xf32> to vector<8x32xf32>
      %54 = arith.subf %41, %53 : vector<8x32xf32>
      %cst_26 = arith.constant 9.99999974E-6 : f32
      %55 = vector.broadcast %cst_26 : f32 to vector<8x1xf32>
      %56 = arith.addf %52, %55 : vector<8x1xf32>
      %57 = math.rsqrt %56 : vector<8x1xf32>
      %58 = vector.broadcast %57 : vector<8x1xf32> to vector<8x32xf32>
      %59 = arith.mulf %54, %58 : vector<8x32xf32>
      %c0_27 = arith.constant 0 : index
      %c0_28 = arith.constant 0 : index
      %60 = vector.load %arg3[%c0_27, %c0_28] : memref<1x32xf32, #tpu.memory_space<vmem>>, vector<1x32xf32>
      %61 = vector.broadcast %60 : vector<1x32xf32> to vector<8x32xf32>
      %62 = arith.mulf %59, %61 : vector<8x32xf32>
      %c0_29 = arith.constant 0 : index
      %c0_30 = arith.constant 0 : index
      %63 = vector.load %arg4[%c0_29, %c0_30] : memref<1x32xf32, #tpu.memory_space<vmem>>, vector<1x32xf32>
      %64 = vector.broadcast %63 : vector<1x32xf32> to vector<8x32xf32>
      %65 = arith.addf %62, %64 : vector<8x32xf32>
      %66 = arith.truncf %65 : vector<8x32xf32> to vector<8x32xbf16>
      %c0_31 = arith.constant 0 : index
      %c0_32 = arith.constant 0 : index
      %67 = vector.load %arg5[%c0_31, %c0_32] : memref<32x96xbf16, #tpu.memory_space<vmem>>, vector<32x96xbf16>
      %cst_33 = arith.constant dense<0.000000e+00> : vector<8x96xf32>
      %68 = tpu.matmul %66, %67, %cst_33 {dimension_numbers = #tpu.dot_dimension_numbers<[1], [0], [0], [1], [0, 0, 1, 1], [], []>} : vector<8x32xbf16>, vector<32x96xbf16>, vector<8x96xf32> -> vector<8x96xf32>
      %c0_34 = arith.constant 0 : index
      %c0_35 = arith.constant 0 : index
      %69 = vector.load %arg6[%c0_34, %c0_35] : memref<1x96xf32, #tpu.memory_space<vmem>>, vector<1x96xf32>
      %70 = vector.broadcast %69 : vector<1x96xf32> to vector<8x96xf32>
      %71 = arith.addf %68, %70 : vector<8x96xf32>
      %72 = vector.extract_strided_slice %71 {offsets = [0, 0], sizes = [8, 8], strides = [1, 1]} : vector<8x96xf32> to vector<8x8xf32>
      %73 = arith.truncf %72 : vector<8x8xf32> to vector<8x8xbf16>
      %c0_36 = arith.constant 0 : index
      %c0_37 = arith.constant 0 : index
      %c0_38 = arith.constant 0 : index
      %74 = vector.load %arg10[%c0_36, %c0_37, %c0_38] : memref<4x8x8xbf16, #tpu.memory_space<vmem>>, vector<1x8x8xbf16>
      %75 = vector.shape_cast %74 : vector<1x8x8xbf16> to vector<8x8xbf16>
      %76 = vector.shape_cast %73 : vector<8x8xbf16> to vector<1x8x8xbf16>
      tpu.vector_store %arg10[%c0_36, %c0_37, %c0_38], %76 {strides = array<i32>} : memref<4x8x8xbf16, #tpu.memory_space<vmem>>, vector<1x8x8xbf16>,
      %77 = vector.extract_strided_slice %71 {offsets = [0, 32], sizes = [8, 8], strides = [1, 1]} : vector<8x96xf32> to vector<8x8xf32>
      %78 = arith.truncf %77 : vector<8x8xf32> to vector<8x8xbf16>
      %c0_39 = arith.constant 0 : index
      %c0_40 = arith.constant 0 : index
      %c0_41 = arith.constant 0 : index
      %79 = vector.load %arg11[%c0_39, %c0_40, %c0_41] : memref<4x8x8xbf16, #tpu.memory_space<vmem>>, vector<1x8x8xbf16>
      %80 = vector.shape_cast %79 : vector<1x8x8xbf16> to vector<8x8xbf16>
      %81 = vector.shape_cast %78 : vector<8x8xbf16> to vector<1x8x8xbf16>
      tpu.vector_store %arg11[%c0_39, %c0_40, %c0_41], %81 {strides = array<i32>} : memref<4x8x8xbf16, #tpu.memory_space<vmem>>, vector<1x8x8xbf16>,
      %82 = vector.extract_strided_slice %71 {offsets = [0, 64], sizes = [8, 8], strides = [1, 1]} : vector<8x96xf32> to vector<8x8xf32>
      %83 = arith.truncf %82 : vector<8x8xf32> to vector<8x8xbf16>
      %c0_42 = arith.constant 0 : index
      %c0_43 = arith.constant 0 : index
      %c0_44 = arith.constant 0 : index
      %84 = vector.load %arg12[%c0_42, %c0_43, %c0_44] : memref<4x8x8xbf16, #tpu.memory_space<vmem>>, vector<1x8x8xbf16>
      %85 = vector.shape_cast %84 : vector<1x8x8xbf16> to vector<8x8xbf16>
      %86 = vector.shape_cast %83 : vector<8x8xbf16> to vector<1x8x8xbf16>
      tpu.vector_store %arg12[%c0_42, %c0_43, %c0_44], %86 {strides = array<i32>} : memref<4x8x8xbf16, #tpu.memory_space<vmem>>, vector<1x8x8xbf16>,
      %87 = vector.extract_strided_slice %71 {offsets = [0, 8], sizes = [8, 8], strides = [1, 1]} : vector<8x96xf32> to vector<8x8xf32>
      %88 = arith.truncf %87 : vector<8x8xf32> to vector<8x8xbf16>
      %c1 = arith.constant 1 : index
      %c0_45 = arith.constant 0 : index
      %c0_46 = arith.constant 0 : index
      %89 = vector.load %arg10[%c1, %c0_45, %c0_46] : memref<4x8x8xbf16, #tpu.memory_space<vmem>>, vector<1x8x8xbf16>
      %90 = vector.shape_cast %89 : vector<1x8x8xbf16> to vector<8x8xbf16>
      %91 = vector.shape_cast %88 : vector<8x8xbf16> to vector<1x8x8xbf16>
      tpu.vector_store %arg10[%c1, %c0_45, %c0_46], %91 {strides = array<i32>} : memref<4x8x8xbf16, #tpu.memory_space<vmem>>, vector<1x8x8xbf16>,
      %92 = vector.extract_strided_slice %71 {offsets = [0, 40], sizes = [8, 8], strides = [1, 1]} : vector<8x96xf32> to vector<8x8xf32>
      %93 = arith.truncf %92 : vector<8x8xf32> to vector<8x8xbf16>
      %c1_47 = arith.constant 1 : index
      %c0_48 = arith.constant 0 : index
      %c0_49 = arith.constant 0 : index
      %94 = vector.load %arg11[%c1_47, %c0_48, %c0_49] : memref<4x8x8xbf16, #tpu.memory_space<vmem>>, vector<1x8x8xbf16>
      %95 = vector.shape_cast %94 : vector<1x8x8xbf16> to vector<8x8xbf16>
      %96 = vector.shape_cast %93 : vector<8x8xbf16> to vector<1x8x8xbf16>
      tpu.vector_store %arg11[%c1_47, %c0_48, %c0_49], %96 {strides = array<i32>} : memref<4x8x8xbf16, #tpu.memory_space<vmem>>, vector<1x8x8xbf16>,
      %97 = vector.extract_strided_slice %71 {offsets = [0, 72], sizes = [8, 8], strides = [1, 1]} : vector<8x96xf32> to vector<8x8xf32>
      %98 = arith.truncf %97 : vector<8x8xf32> to vector<8x8xbf16>
      %c1_50 = arith.constant 1 : index
      %c0_51 = arith.constant 0 : index
      %c0_52 = arith.constant 0 : index
      %99 = vector.load %arg12[%c1_50, %c0_51, %c0_52] : memref<4x8x8xbf16, #tpu.memory_space<vmem>>, vector<1x8x8xbf16>
      %100 = vector.shape_cast %99 : vector<1x8x8xbf16> to vector<8x8xbf16>
      %101 = vector.shape_cast %98 : vector<8x8xbf16> to vector<1x8x8xbf16>
      tpu.vector_store %arg12[%c1_50, %c0_51, %c0_52], %101 {strides = array<i32>} : memref<4x8x8xbf16, #tpu.memory_space<vmem>>, vector<1x8x8xbf16>,
      %102 = vector.extract_strided_slice %71 {offsets = [0, 16], sizes = [8, 8], strides = [1, 1]} : vector<8x96xf32> to vector<8x8xf32>
      %103 = arith.truncf %102 : vector<8x8xf32> to vector<8x8xbf16>
      %c2 = arith.constant 2 : index
      %c0_53 = arith.constant 0 : index
      %c0_54 = arith.constant 0 : index
      %104 = vector.load %arg10[%c2, %c0_53, %c0_54] : memref<4x8x8xbf16, #tpu.memory_space<vmem>>, vector<1x8x8xbf16>
      %105 = vector.shape_cast %104 : vector<1x8x8xbf16> to vector<8x8xbf16>
      %106 = vector.shape_cast %103 : vector<8x8xbf16> to vector<1x8x8xbf16>
      tpu.vector_store %arg10[%c2, %c0_53, %c0_54], %106 {strides = array<i32>} : memref<4x8x8xbf16, #tpu.memory_space<vmem>>, vector<1x8x8xbf16>,
      %107 = vector.extract_strided_slice %71 {offsets = [0, 48], sizes = [8, 8], strides = [1, 1]} : vector<8x96xf32> to vector<8x8xf32>
      %108 = arith.truncf %107 : vector<8x8xf32> to vector<8x8xbf16>
      %c2_55 = arith.constant 2 : index
      %c0_56 = arith.constant 0 : index
      %c0_57 = arith.constant 0 : index
      %109 = vector.load %arg11[%c2_55, %c0_56, %c0_57] : memref<4x8x8xbf16, #tpu.memory_space<vmem>>, vector<1x8x8xbf16>
      %110 = vector.shape_cast %109 : vector<1x8x8xbf16> to vector<8x8xbf16>
      %111 = vector.shape_cast %108 : vector<8x8xbf16> to vector<1x8x8xbf16>
      tpu.vector_store %arg11[%c2_55, %c0_56, %c0_57], %111 {strides = array<i32>} : memref<4x8x8xbf16, #tpu.memory_space<vmem>>, vector<1x8x8xbf16>,
      %112 = vector.extract_strided_slice %71 {offsets = [0, 80], sizes = [8, 8], strides = [1, 1]} : vector<8x96xf32> to vector<8x8xf32>
      %113 = arith.truncf %112 : vector<8x8xf32> to vector<8x8xbf16>
      %c2_58 = arith.constant 2 : index
      %c0_59 = arith.constant 0 : index
      %c0_60 = arith.constant 0 : index
      %114 = vector.load %arg12[%c2_58, %c0_59, %c0_60] : memref<4x8x8xbf16, #tpu.memory_space<vmem>>, vector<1x8x8xbf16>
      %115 = vector.shape_cast %114 : vector<1x8x8xbf16> to vector<8x8xbf16>
      %116 = vector.shape_cast %113 : vector<8x8xbf16> to vector<1x8x8xbf16>
      tpu.vector_store %arg12[%c2_58, %c0_59, %c0_60], %116 {strides = array<i32>} : memref<4x8x8xbf16, #tpu.memory_space<vmem>>, vector<1x8x8xbf16>,
      %117 = vector.extract_strided_slice %71 {offsets = [0, 24], sizes = [8, 8], strides = [1, 1]} : vector<8x96xf32> to vector<8x8xf32>
      %118 = arith.truncf %117 : vector<8x8xf32> to vector<8x8xbf16>
      %c3 = arith.constant 3 : index
      %c0_61 = arith.constant 0 : index
      %c0_62 = arith.constant 0 : index
      %119 = vector.load %arg10[%c3, %c0_61, %c0_62] : memref<4x8x8xbf16, #tpu.memory_space<vmem>>, vector<1x8x8xbf16>
      %120 = vector.shape_cast %119 : vector<1x8x8xbf16> to vector<8x8xbf16>
      %121 = vector.shape_cast %118 : vector<8x8xbf16> to vector<1x8x8xbf16>
      tpu.vector_store %arg10[%c3, %c0_61, %c0_62], %121 {strides = array<i32>} : memref<4x8x8xbf16, #tpu.memory_space<vmem>>, vector<1x8x8xbf16>,
      %122 = vector.extract_strided_slice %71 {offsets = [0, 56], sizes = [8, 8], strides = [1, 1]} : vector<8x96xf32> to vector<8x8xf32>
      %123 = arith.truncf %122 : vector<8x8xf32> to vector<8x8xbf16>
      %c3_63 = arith.constant 3 : index
      %c0_64 = arith.constant 0 : index
      %c0_65 = arith.constant 0 : index
      %124 = vector.load %arg11[%c3_63, %c0_64, %c0_65] : memref<4x8x8xbf16, #tpu.memory_space<vmem>>, vector<1x8x8xbf16>
      %125 = vector.shape_cast %124 : vector<1x8x8xbf16> to vector<8x8xbf16>
      %126 = vector.shape_cast %123 : vector<8x8xbf16> to vector<1x8x8xbf16>
      tpu.vector_store %arg11[%c3_63, %c0_64, %c0_65], %126 {strides = array<i32>} : memref<4x8x8xbf16, #tpu.memory_space<vmem>>, vector<1x8x8xbf16>,
      %127 = vector.extract_strided_slice %71 {offsets = [0, 88], sizes = [8, 8], strides = [1, 1]} : vector<8x96xf32> to vector<8x8xf32>
      %128 = arith.truncf %127 : vector<8x8xf32> to vector<8x8xbf16>
      %c3_66 = arith.constant 3 : index
      %c0_67 = arith.constant 0 : index
      %c0_68 = arith.constant 0 : index
      %129 = vector.load %arg12[%c3_66, %c0_67, %c0_68] : memref<4x8x8xbf16, #tpu.memory_space<vmem>>, vector<1x8x8xbf16>
      %130 = vector.shape_cast %129 : vector<1x8x8xbf16> to vector<8x8xbf16>
      %131 = vector.shape_cast %128 : vector<8x8xbf16> to vector<1x8x8xbf16>
      tpu.vector_store %arg12[%c3_66, %c0_67, %c0_68], %131 {strides = array<i32>} : memref<4x8x8xbf16, #tpu.memory_space<vmem>>, vector<1x8x8xbf16>,
    } else {
    }
    %c8_i32 = arith.constant 8 : i32
    %3 = arith.muli %arg1, %c8_i32 : i32
    %4 = tpu.assume_multiple %3, 8 : i32
    %c0 = arith.constant 0 : index
    %5 = arith.index_cast %4 : i32 to index
    %c0_1 = arith.constant 0 : index
    %6 = vector.load %arg10[%c0, %5, %c0_1] : memref<4x8x8xbf16, #tpu.memory_space<vmem>>, vector<4x8x8xbf16>
    %c0_2 = arith.constant 0 : index
    %c0_3 = arith.constant 0 : index
    %c0_4 = arith.constant 0 : index
    %7 = vector.load %arg11[%c0_2, %c0_3, %c0_4] : memref<4x8x8xbf16, #tpu.memory_space<vmem>>, vector<4x8x8xbf16>
    %c0_5 = arith.constant 0 : index
    %c0_6 = arith.constant 0 : index
    %c0_7 = arith.constant 0 : index
    %8 = vector.load %arg12[%c0_5, %c0_6, %c0_7] : memref<4x8x8xbf16, #tpu.memory_space<vmem>>, vector<4x8x8xbf16>
    "tpu.trace_start"() <{level = 10 : i32, message = "hqd,hkd->hqk"}> : () -> ()
    %cst = arith.constant dense<0.000000e+00> : vector<4x8x8xf32>
    %9 = tpu.matmul %6, %7, %cst {dimension_numbers = #tpu.dot_dimension_numbers<[2], [2], [1], [1], [0, 0, 0, 1, 1, 1], [0], [0]>} : vector<4x8x8xbf16>, vector<4x8x8xbf16>, vector<4x8x8xf32> -> vector<4x8x8xf32>
    "tpu.trace_stop"() : () -> ()
    %cst_8 = arith.constant dense<0xFF800000> : vector<4x8xf32>
    %10 = vector.multi_reduction <maximumf>, %9, %cst_8 [2] : vector<4x8x8xf32> to vector<4x8xf32>
    %11 = vector.shape_cast %10 : vector<4x8xf32> to vector<4x8x1xf32>
    %12 = vector.broadcast %11 : vector<4x8x1xf32> to vector<4x8x8xf32>
    %13 = arith.subf %9, %12 : vector<4x8x8xf32>
    %14 = math.exp %13 : vector<4x8x8xf32>
    %cst_9 = arith.constant dense<0.000000e+00> : vector<4x8xf32>
    %15 = vector.multi_reduction <add>, %14, %cst_9 [2] : vector<4x8x8xf32> to vector<4x8xf32>
    %16 = vector.shape_cast %15 : vector<4x8xf32> to vector<4x8x1xf32>
    %17 = arith.truncf %14 : vector<4x8x8xf32> to vector<4x8x8xbf16>
    "tpu.trace_start"() <{level = 10 : i32, message = "hqk,hkd->hqd"}> : () -> ()
    %cst_10 = arith.constant dense<0.000000e+00> : vector<4x8x8xf32>
    %18 = tpu.matmul %17, %8, %cst_10 {dimension_numbers = #tpu.dot_dimension_numbers<[2], [1], [1], [2], [0, 0, 0, 1, 1, 2], [0], [0]>} : vector<4x8x8xbf16>, vector<4x8x8xbf16>, vector<4x8x8xf32> -> vector<4x8x8xf32>
    "tpu.trace_stop"() : () -> ()
    %19 = tpu.reciprocal %16 {approx = true} : vector<4x8x1xf32> -> vector<4x8x1xf32>
    %20 = vector.broadcast %19 : vector<4x8x1xf32> to vector<4x8x8xf32>
    %21 = arith.mulf %18, %20 : vector<4x8x8xf32>
    %22 = vector.extract_strided_slice %21 {offsets = [0, 0, 0], sizes = [1, 8, 8], strides = [1, 1, 1]} : vector<4x8x8xf32> to vector<1x8x8xf32>
    %23 = vector.shape_cast %22 : vector<1x8x8xf32> to vector<8x8xf32>
    %24 = vector.extract_strided_slice %21 {offsets = [1, 0, 0], sizes = [1, 8, 8], strides = [1, 1, 1]} : vector<4x8x8xf32> to vector<1x8x8xf32>
    %25 = vector.shape_cast %24 : vector<1x8x8xf32> to vector<8x8xf32>
    %26 = vector.extract_strided_slice %21 {offsets = [2, 0, 0], sizes = [1, 8, 8], strides = [1, 1, 1]} : vector<4x8x8xf32> to vector<1x8x8xf32>
    %27 = vector.shape_cast %26 : vector<1x8x8xf32> to vector<8x8xf32>
    %28 = vector.extract_strided_slice %21 {offsets = [3, 0, 0], sizes = [1, 8, 8], strides = [1, 1, 1]} : vector<4x8x8xf32> to vector<1x8x8xf32>
    %29 = vector.shape_cast %28 : vector<1x8x8xf32> to vector<8x8xf32>
    %30 = tpu.concatenate %23, %25, %27, %29 in 1 : vector<8x8xf32>, vector<8x8xf32>, vector<8x8xf32>, vector<8x8xf32> -> vector<8x32xf32>
    %31 = arith.truncf %30 : vector<8x32xf32> to vector<8x32xbf16>
    %c0_11 = arith.constant 0 : index
    %c0_12 = arith.constant 0 : index
    %32 = vector.load %arg7[%c0_11, %c0_12] : memref<32x32xbf16, #tpu.memory_space<vmem>>, vector<32x32xbf16>
    %cst_13 = arith.constant dense<0.000000e+00> : vector<8x32xf32>
    %33 = tpu.matmul %31, %32, %cst_13 {dimension_numbers = #tpu.dot_dimension_numbers<[1], [0], [0], [1], [0, 0, 1, 1], [], []>} : vector<8x32xbf16>, vector<32x32xbf16>, vector<8x32xf32> -> vector<8x32xf32>
    %c0_14 = arith.constant 0 : index
    %c0_15 = arith.constant 0 : index
    %34 = vector.load %arg8[%c0_14, %c0_15] : memref<1x32xf32, #tpu.memory_space<vmem>>, vector<1x32xf32>
    %35 = vector.broadcast %34 : vector<1x32xf32> to vector<8x32xf32>
    %36 = arith.addf %33, %35 : vector<8x32xf32>
    %c0_16 = arith.constant 0 : index
    %c0_17 = arith.constant 0 : index
    %c0_18 = arith.constant 0 : index
    %37 = vector.load %arg9[%c0_16, %c0_17, %c0_18] : memref<1x8x32xf32, #tpu.memory_space<vmem>>, vector<1x8x32xf32>
    %38 = vector.shape_cast %37 : vector<1x8x32xf32> to vector<8x32xf32>
    %39 = vector.shape_cast %36 : vector<8x32xf32> to vector<1x8x32xf32>
    tpu.vector_store %arg9[%c0_16, %c0_17, %c0_18], %39 {strides = array<i32>} : memref<1x8x32xf32, #tpu.memory_space<vmem>>, vector<1x8x32xf32>,
    return
  }
  func.func @transform_0(%arg0: i32, %arg1: i32) -> (i32, i32, i32) {
    %c0_i32 = arith.constant 0 : i32
    %c0_i32_0 = arith.constant 0 : i32
    %c0_i32_1 = arith.constant 0 : i32
    return %arg0, %c0_i32, %c0_i32_0 : i32, i32, i32
  }
  func.func @transform_1(%arg0: i32, %arg1: i32) -> (i32, i32) {
    %c0_i32 = arith.constant 0 : i32
    %c0_i32_0 = arith.constant 0 : i32
    %c0_i32_1 = arith.constant 0 : i32
    return %c0_i32, %c0_i32_0 : i32, i32
  }
  func.func @transform_2(%arg0: i32, %arg1: i32) -> (i32, i32) {
    %c0_i32 = arith.constant 0 : i32
    %c0_i32_0 = arith.constant 0 : i32
    %c0_i32_1 = arith.constant 0 : i32
    return %c0_i32, %c0_i32_0 : i32, i32
  }
  func.func @transform_3(%arg0: i32, %arg1: i32) -> (i32, i32) {
    %c0_i32 = arith.constant 0 : i32
    %c0_i32_0 = arith.constant 0 : i32
    %c0_i32_1 = arith.constant 0 : i32
    return %c0_i32, %c0_i32_0 : i32, i32
  }
  func.func @transform_4(%arg0: i32, %arg1: i32) -> (i32, i32) {
    %c0_i32 = arith.constant 0 : i32
    %c0_i32_0 = arith.constant 0 : i32
    %c0_i32_1 = arith.constant 0 : i32
    return %c0_i32, %c0_i32_0 : i32, i32
  }
  func.func @transform_5(%arg0: i32, %arg1: i32) -> (i32, i32) {
    %c0_i32 = arith.constant 0 : i32
    %c0_i32_0 = arith.constant 0 : i32
    %c0_i32_1 = arith.constant 0 : i32
    return %c0_i32, %c0_i32_0 : i32, i32
  }
  func.func @transform_6(%arg0: i32, %arg1: i32) -> (i32, i32) {
    %c0_i32 = arith.constant 0 : i32
    %c0_i32_0 = arith.constant 0 : i32
    %c0_i32_1 = arith.constant 0 : i32
    return %c0_i32, %c0_i32_0 : i32, i32
  }
  func.func @transform_7(%arg0: i32, %arg1: i32) -> (i32, i32, i32) {
    %c0_i32 = arith.constant 0 : i32
    %c0_i32_0 = arith.constant 0 : i32
    return %arg0, %arg1, %c0_i32 : i32, i32, i32
  }
}

</mosaic_0001>

<bundles_post_ra>
// kernel: tpu_custom_call.1
= control target key start
LH: loop header
LB: loop body
LE: loop exit
PB: predicated region body
PF: predicated region fallthrough
CT: control target
= control target key end

     0   :  { %s2298_s0 = inlined_call_operand.hbm [shape: f32[2,8,32], index: 0, kind: input, shape index: {}]   ;;  %s2299_s1 = inlined_call_operand.hbm [shape: f32[1,32], index: 1, kind: input, shape index: {}]   ;;  %s2300_s2 = inlined_call_operand.hbm [shape: f32[1,32], index: 2, kind: input, shape index: {}]   ;;  %s2301_s3 = inlined_call_operand.hbm [shape: bf16[32,96], index: 3, kind: input, shape index: {}]   ;;  %s2302_s4 = inlined_call_operand.hbm [shape: f32[1,96], index: 4, kind: input, shape index: {}]   ;;  %s2303_s5 = inlined_call_operand.hbm [shape: bf16[32,32], index: 5, kind: input, shape index: {}]   ;;  %s2304_s6 = inlined_call_operand.hbm [shape: f32[1,32], index: 6, kind: input, shape index: {}]   ;;  %s2305_s7 = inlined_call_operand.hbm [shape: f32[2,8,32], index: 7, kind: output, shape index: {}]  }
   0x1   :  { %2311 = sst [smem:[#allocation23_spill]] %s2299_s1 }
   0x2   :  { %2312 = sst [smem:[#allocation24_spill]] %s2301_s3 }
   0x3   :  { %12 = vsyncpa [#allocation6], 0 }
   0x4   :  { %14 = vsyncpa [#allocation6 + $0x1], 0 }
   0x5   :  { %15 = vsyncpa [#allocation9], 0 }
   0x6   :  { %16 = vsyncpa [#allocation12], 0 }
   0x7   :  { %17 = vsyncpa [#allocation15], 0 }
   0x8   :  { %18 = vsyncpa [#allocation7], 0 }
   0x9   :  { %20 = vsyncpa [#allocation7 + $0x1], 0  ;;  %s1878_s24 = smov 0   ;;  %s1880_s25 = smov 0  }
   0xa   :  { %s1882_s26 = smov 0   ;;  %s1884_s27 = smov 0  }
   0xb   :  { %s1886_s28 = smov 0   ;;  %s1888_s29 = smov 0  }
   0xc LB: > { %s2309_s30 = sadd.s32 4294967295, %s1810_s29   ;;  %p1226_p0 = scmp.ge.s32.totalorder %s1810_s29, 1  ;;  %s1810_s29 = sphi %s1888_s29, %s26_s29   ;;  %s1806_s28 = sphi %s1886_s28, %s2335_s28   ;;  %s1802_s27 = sphi %s1884_s27, %s2334_s27   ;;  %s1798_s26 = sphi %s1882_s26, %s2333_s26   ;;  %s1794_s25 = sphi %s1880_s25, %s2332_s25   ;;  %s1790_s24 = sphi %s1878_s24, %s2331_s24  }
   0xd   : > { %p1912_p1 = scmp.eq.s32.totalorder %s2309_s30, 0  ;;  %p223_p2 = scmp.lt.s32.totalorder %s1810_s29, 3 }
   0xe   : > { %s1812_s10 = smov [#allocation8]   ;;  %s1813_s12 = smov [#allocation11]  }
   0xf   : > { %s2313_s8 = scalar_select %p1912_p1, 1, 0 }
  0x10   : > { %p1917_p3 = pnand %p1226_p0, %p223_p2  ;;  %s236_s11 = sshll.u32 %s1812_s10, 4  ;;  %s237_s11 = int_to_ptr.vmem [resolvable:$true] %s236_s11 }
  0x11   : > { %s257_s13 = sshll.u32 %s1813_s12, 4  ;;  %s1814_s15 = smov [#allocation14]   ;;  %s1930_s13 = int_to_ptr.vmem [resolvable:$true] %s257_s13 }
  0x12   : > { %s2314_s9 = scalar_select %p1917_p3, 1, 0 }
  0x13   : > { %p1383_p5 = pneg %p1917_p3  ;;  %s1932_s16 = sshll.u32 %s1814_s15, 4  ;;  %s282_s16 = int_to_ptr.vmem [resolvable:$true] %s1932_s16 }
  0x14   : > { %s2316_s1 = sld [smem:[#allocation23_spill]] }
  0x15   : > { %p1926_p6 = pnand %p1383_p5, %p1912_p1 }
  0x17   : > { %p1942_p8 = pneg %p1926_p6 }
  0x1a   : > { %s1518_s19 = scalar_lea.hbm %s2316_s1, 16 }
  0x1b   : > { %p1519_p7 = scmp.ne.s32.totalorder %s2316_s1, %s1518_s19  ;;  %p1525_p11 = scmp.lt.u32.totalorder %s1518_s19, %s2316_s1 }
  0x1d   : > { %p1521_p9 = pnand %p1942_p8, %p1519_p7 }
  0x1f   : > { %p1522_p10 = pneg %p1521_p9 }
  0x21   : > { %p1527_p12 = pnand %p1525_p11, %p1522_p10 }
  0x23   : > { %1530 = shalt.err (!%p1527_p12)
}
  0x24   : > { %s1531_s12 = scalar_lea.vmem %s237_s11, 16  ;;  %s1538_s15 = scalar_lea.vmem %s237_s11, 32 }
  0x25   : > { %p1532_p13 = scmp.ne.s32.totalorder %s237_s11, %s1531_s12  ;;  %p1539_p5 = scmp.lt.s32.totalorder %s237_s11, %s237_s11 }
  0x26   : > { %p1540_p4 = scmp.lt.s32.totalorder %s1538_s15, %s1531_s12 }
  0x27   : > { %p1534_p0 = pnand %p1532_p13, %p1942_p8 }
  0x28   : > { %p1541_p3 = por %p1540_p4, %p1539_p5 }
  0x29   : > { %p1535_p2 = pneg %p1534_p0 }
  0x2b   : > { %p1542_p1 = pnand %p1541_p3, %p1535_p2 }
  0x2d   : > { %1545 = shalt.err (!%p1542_p1)
}
  0x2e   : > { %1386 = dma.hbm_to_vmem [thread:$0]  (!%p1926_p6), %s2316_s1, 16, %s237_s11, [#allocation9]  }
  0x2f   : > { %s2318_s3 = sld [smem:[#allocation24_spill]] }
  0x35   : > { %s1546_s21 = scalar_lea.hbm %s2318_s3, 256 }
  0x36   : > { %p1547_p7 = scmp.ne.s32.totalorder %s2318_s3, %s1546_s21  ;;  %p1553_p1 = scmp.lt.u32.totalorder %s1546_s21, %s2318_s3 }
  0x38   : > { %p1549_p9 = pnand %p1547_p7, %p1942_p8 }
  0x3a   : > { %p1550_p4 = pneg %p1549_p9 }
  0x3c   : > { %p1555_p3 = pnand %p1553_p1, %p1550_p4 }
  0x3e   : > { %1558 = shalt.err (!%p1555_p3)
}
  0x3f   : > { %s1559_s11 = scalar_lea.vmem %s1930_s13, 256  ;;  %p1567_p13 = scmp.lt.s32.totalorder %s1930_s13, %s1930_s13 }
  0x40   : > { %p1560_p10 = scmp.ne.s32.totalorder %s1930_s13, %s1559_s11  ;;  %p1568_p0 = scmp.lt.s32.totalorder %s1559_s11, %s1559_s11 }
  0x42   : > { %p1562_p11 = pnand %p1560_p10, %p1942_p8  ;;  %p1569_p2 = por %p1568_p0, %p1567_p13 }
  0x44   : > { %p1563_p12 = pneg %p1562_p11 }
  0x46   : > { %p1570_p5 = pnand %p1569_p2, %p1563_p12 }
  0x48   : > { %1573 = shalt.err (!%p1570_p5)
}
  0x49   : > { %s1815_s17 = smov 64   ;;  %s1816_s18 = smov 4  }
  0x4a   : > { %1392 = dma.hbm_to_vmem [thread:$0]  (!%p1926_p6), %s2318_s3, 256, %s1930_s13, [#allocation12], %s1815_s17, %s1815_s17, %s1816_s18  }
  0x4b   : > { %s1574_s10 = scalar_lea.hbm %s2303_s5, 256 }
  0x4c   : > { %p1575_p7 = scmp.ne.s32.totalorder %s2303_s5, %s1574_s10  ;;  %p1581_p1 = scmp.lt.u32.totalorder %s1574_s10, %s2303_s5 }
  0x4e   : > { %p1577_p9 = pnand %p1575_p7, %p1942_p8 }
  0x50   : > { %p1578_p4 = pneg %p1577_p9 }
  0x52   : > { %p1583_p3 = pnand %p1581_p1, %p1578_p4 }
  0x54   : > { %1586 = shalt.err (!%p1583_p3)
}
  0x55   : > { %s1587_s19 = scalar_lea.vmem %s282_s16, 256  ;;  %p1595_p13 = scmp.lt.s32.totalorder %s282_s16, %s282_s16 }
  0x56   : > { %p1588_p10 = scmp.ne.s32.totalorder %s282_s16, %s1587_s19  ;;  %p1596_p0 = scmp.lt.s32.totalorder %s1587_s19, %s1587_s19 }
  0x58   : > { %p1590_p11 = pnand %p1588_p10, %p1942_p8  ;;  %p1597_p2 = por %p1596_p0, %p1595_p13 }
  0x5a   : > { %p1591_p12 = pneg %p1590_p11 }
  0x5c   : > { %p1598_p5 = pnand %p1597_p2, %p1591_p12 }
  0x5e   : > { %1601 = shalt.err (!%p1598_p5)
}
  0x5f   : > { %1398 = dma.hbm_to_vmem [thread:$0]  (!%p1926_p6), %s2303_s5, 256, %s282_s16, [#allocation15], %s1815_s17, %s1815_s17, %s1816_s18  }
  0x60   : > { %s1817_s30 = smov [#allocation10]   ;;  %s1818_s23 = smov [#allocation13]  }
  0x61   : > { %s247_s21 = sshll.u32 %s1817_s30, 4  ;;  %s271_s10 = sshll.u32 %s1818_s23, 4  ;;  %s248_s21 = int_to_ptr.vmem [resolvable:$true] %s247_s21  ;;  %s272_s10 = int_to_ptr.vmem [resolvable:$true] %s271_s10 }
  0x62   : > { %s1602_s11 = scalar_lea.hbm %s2300_s2, 16 }
  0x63   : > { %p1603_p7 = scmp.ne.s32.totalorder %s2300_s2, %s1602_s11  ;;  %p1609_p1 = scmp.lt.u32.totalorder %s1602_s11, %s2300_s2 }
  0x65   : > { %p1605_p9 = pnand %p1603_p7, %p1942_p8 }
  0x67   : > { %p1606_p4 = pneg %p1605_p9 }
  0x69   : > { %p1611_p3 = pnand %p1609_p1, %p1606_p4 }
  0x6b   : > { %1614 = shalt.err (!%p1611_p3)
}
  0x6c   : > { %s1615_s16 = scalar_lea.vmem %s248_s21, 16  ;;  %s1622_s17 = scalar_lea.vmem %s248_s21, 32 }
  0x6d   : > { %p1616_p10 = scmp.ne.s32.totalorder %s248_s21, %s1615_s16  ;;  %p1623_p13 = scmp.lt.s32.totalorder %s248_s21, %s248_s21 }
  0x6e   : > { %p1624_p0 = scmp.lt.s32.totalorder %s1622_s17, %s1615_s16 }
  0x6f   : > { %p1618_p11 = pnand %p1616_p10, %p1942_p8 }
  0x70   : > { %p1625_p2 = por %p1624_p0, %p1623_p13 }
  0x71   : > { %p1619_p12 = pneg %p1618_p11 }
  0x73   : > { %p1626_p5 = pnand %p1625_p2, %p1619_p12 }
  0x75   : > { %1629 = shalt.err (!%p1626_p5)
}
  0x76   : > { %1389 = dma.hbm_to_vmem [thread:$0]  (!%p1926_p6), %s2300_s2, 16, %s248_s21, [#allocation9]  }
  0x77   : > { %s1630_s30 = scalar_lea.hbm %s2302_s4, 16 }
  0x78   : > { %p1631_p7 = scmp.ne.s32.totalorder %s2302_s4, %s1630_s30  ;;  %p1637_p1 = scmp.lt.u32.totalorder %s1630_s30, %s2302_s4 }
  0x7a   : > { %p1633_p9 = pnand %p1631_p7, %p1942_p8 }
  0x7c   : > { %p1634_p4 = pneg %p1633_p9 }
  0x7e   : > { %p1639_p3 = pnand %p1637_p1, %p1634_p4 }
  0x80   : > { %1642 = shalt.err (!%p1639_p3)
}
  0x81   : > { %s1643_s19 = scalar_lea.vmem %s272_s10, 16  ;;  %s1650_s21 = scalar_lea.vmem %s272_s10, 32 }
  0x82   : > { %p1644_p10 = scmp.ne.s32.totalorder %s272_s10, %s1643_s19  ;;  %p1651_p13 = scmp.lt.s32.totalorder %s272_s10, %s272_s10 }
  0x83   : > { %p1652_p0 = scmp.lt.s32.totalorder %s1650_s21, %s1643_s19 }
  0x84   : > { %p1646_p11 = pnand %p1644_p10, %p1942_p8 }
  0x85   : > { %p1653_p2 = por %p1652_p0, %p1651_p13 }
  0x86   : > { %p1647_p12 = pneg %p1646_p11 }
  0x88   : > { %p1654_p5 = pnand %p1653_p2, %p1647_p12 }
  0x8a   : > { %1657 = shalt.err (!%p1654_p5)
}
  0x8b   : > { %1395 = dma.hbm_to_vmem [thread:$0]  (!%p1926_p6), %s2302_s4, 16, %s272_s10, [#allocation12]  }
  0x8c   : > { %s1819_s17 = smov [#allocation16]   ;;  %s1658_s20 = scalar_lea.hbm %s2304_s6, 16 }
  0x8d   : > { %s295_s1 = sshll.u32 %s1819_s17, 4  ;;  %p1659_p7 = scmp.ne.s32.totalorder %s2304_s6, %s1658_s20  ;;  %s296_s1 = int_to_ptr.vmem [resolvable:$true] %s295_s1 }
  0x8e   : > { %p1665_p1 = scmp.lt.u32.totalorder %s1658_s20, %s2304_s6 }
  0x8f   : > { %p1661_p9 = pnand %p1659_p7, %p1942_p8 }
  0x91   : > { %p1662_p4 = pneg %p1661_p9 }
  0x93   : > { %p1667_p3 = pnand %p1665_p1, %p1662_p4 }
  0x95   : > { %1670 = shalt.err (!%p1667_p3)
}
  0x96   : > { %s1671_s10 = scalar_lea.vmem %s296_s1, 16  ;;  %s1678_s11 = scalar_lea.vmem %s296_s1, 32 }
  0x97   : > { %p1672_p10 = scmp.ne.s32.totalorder %s296_s1, %s1671_s10  ;;  %p1679_p13 = scmp.lt.s32.totalorder %s296_s1, %s296_s1 }
  0x98   : > { %p1680_p0 = scmp.lt.s32.totalorder %s1678_s11, %s1671_s10 }
  0x99   : > { %p1674_p11 = pnand %p1672_p10, %p1942_p8 }
  0x9a   : > { %p1681_p2 = por %p1680_p0, %p1679_p13 }
  0x9b   : > { %p1675_p12 = pneg %p1674_p11 }
  0x9d   : > { %p1682_p5 = pnand %p1681_p2, %p1675_p12 }
  0x9f   : > { %1685 = shalt.err (!%p1682_p5)
}
  0xa0   : > { %1401 = dma.hbm_to_vmem [thread:$0]  (!%p1926_p6), %s2304_s6, 16, %s296_s1, [#allocation15]  }
  0xa1   : > { %s1225_s22 = sadd.s32 4294967294, %s1810_s29   ;;  %s38_s13 = sadd.s32 1, %s1806_s28 }
  0xa2   : > { %p40_p8 = scmp.ge.s32.totalorder %s38_s13, 2  ;;  %s45_s14 = sadd.s32 1, %s1798_s26 }
  0xa3   : > { %p52_p7 = scmp.ne.s32.totalorder %s1798_s26, %s1794_s25  ;;  %p53_p9 = scmp.eq.s32.totalorder %s1810_s29, 0 }
  0xa4   : > { %s2337_s13 = smov (%p40_p8, %s38_s13), 0  ;;  %p58_p1 = scmp.ne.s32.totalorder %s1794_s25, %s1790_s24 }
  0xa5   : > { %p2062_p4 = por %p53_p9, %p52_p7  ;;  %s42_s17 = ssub.s32 %s1806_s28, %s2337_s13 }
  0xa6   : > { %s2320_s1 = sadd.s32 4294967295, %s1810_s29   ;;  %p43_p3 = scmp.eq.s32.totalorder %s42_s17, 0 }
  0xa7   : > { %p210_p6 = scmp.eq.s32.totalorder %s2320_s1, 1  ;;  %p2321_p10 = scmp.ne.s32.totalorder %s2313_s8, 0 }
  0xa8   : > { %p216_p13 = scmp.eq.s32.totalorder %s1225_s22, 1  ;;  %p1416_p2 = scmp.lt.s32.totalorder %s1810_s29, 2 }
  0xa9   : > { %p2074_p11 = por %p2321_p10, %p58_p1  ;;  %p2078_p12 = por %p210_p6, %p52_p7 }
  0xaa   : > { %s2083_s20 = scalar_select %p43_p3, %s1798_s26, %s45_s14  }
  0xab   : > { %s2323_s3 = scalar_select %p2078_p12, 1, 0 }
  0xac   : > { %p2085_p0 = por %p216_p13, %p58_p1  ;;  %s306_s23 = sand.u32 1, %s1798_s26  }
  0xad   : > { %s1235_s12 = sshll.u32 %s1806_s28, 7  ;;  %s1234_s15 = sshll.u32 %s306_s23, 3 }
  0xae   : > { %s2324_s30 = scalar_select %p2085_p0, 1, 0 }
  0xaf   : > { %s2095_s19 = scalar_lea.hbm %s2298_s0, %s1235_s12  ;;  %s310_s21 = scalar_lea.vmem [#allocation5], %s1234_s15 }
  0xb0   : > { %s317_s22 = sshll.u32 %s310_s21, 4  ;;  %p2099_p5 = pnand %p1416_p2, %p2062_p4  ;;  %s2103_s22 = int_to_ptr.vmem [resolvable:$true] %s317_s22 }
  0xb1   : > { %s307_s17 = scalar_lea.sflag [#allocation6], %s306_s23  ;;  %s1686_s1 = scalar_lea.hbm %s2095_s19, 128 }
  0xb2   : > { %p1687_p8 = scmp.ne.s32.totalorder %s2095_s19, %s1686_s1  ;;  %p1688_p7 = pneg %p2099_p5 }
  0xb3   : > { %s1691_s16 = scalar_lea.hbm %s2298_s0, 256  ;;  %p1692_p4 = scmp.lt.u32.totalorder %s2095_s19, %s2298_s0 }
  0xb4   : > { %p1689_p9 = pnand %p1688_p7, %p1687_p8  ;;  %p1693_p6 = scmp.lt.u32.totalorder %s1691_s16, %s1686_s1 }
  0xb5   : > { %p1695_p10 = scmp.lt.u32.totalorder %s1686_s1, %s2095_s19 }
  0xb6   : > { %p1690_p1 = pneg %p1689_p9  ;;  %p1694_p3 = por %p1693_p6, %p1692_p4 }
  0xb8   : > { %p1696_p13 = por %p1695_p10, %p1694_p3 }
  0xba   : > { %p1697_p2 = pnand %p1696_p13, %p1690_p1 }
  0xbc   : > { %1700 = shalt.err (!%p1697_p2)
}
  0xbd   : > { %s1701_s23 = scalar_lea.vmem %s2103_s22, 128  ;;  %s1820_s21 = smov [#allocation5]  }
  0xbe   : > { %p1702_p8 = scmp.ne.s32.totalorder %s2103_s22, %s1701_s23  ;;  %s1706_s12 = sshll.u32 %s1820_s21, 4  ;;  %s1707_s12 = int_to_ptr.vmem [resolvable:$false] %s1706_s12 }
  0xbf   : > { %s1708_s15 = scalar_lea.vmem %s1707_s12, 256  ;;  %p1709_p12 = scmp.lt.s32.totalorder %s2103_s22, %s1707_s12 }
  0xc0   : > { %p1704_p9 = pnand %p1702_p8, %p1688_p7  ;;  %p1710_p4 = scmp.lt.s32.totalorder %s1708_s15, %s1701_s23 }
  0xc2   : > { %p1705_p0 = pneg %p1704_p9  ;;  %p1711_p6 = por %p1710_p4, %p1709_p12 }
  0xc4   : > { %p1712_p3 = pnand %p1711_p6, %p1705_p0 }
  0xc6   : > { %1715 = shalt.err (!%p1712_p3)
}
  0xc7   : > { %1405 = dma.hbm_to_vmem [thread:$0]  (!%p2099_p5), %s2095_s19, 128, %s2103_s22, %s307_s17  }
  0xc8   : > { %p2326_p1 = scmp.ne.s32.totalorder %s2314_s9, 0 }
  0xc9   : > { %s2133_s1 = sand.u32 (!%p2326_p1), 1, %s1794_s25  }
  0xca   : > { %326 = sbr.rel (%p2326_p1) target bundleno = 1831 (0x727), region = 48  ;;  %s1237_s16 = sshll.u32 (!%p2326_p1), %s2133_s1, 3 }
  0xcb   : > { %s329_s10 = scalar_lea.sflag (!%p2326_p1), [#allocation6], %s2133_s1  ;;  %s332_s11 = scalar_lea.vmem (!%p2326_p1), [#allocation5], %s1237_s16 }
  0xd1   : > { %1769 = dma.done.wait (%p2074_p11), %s329_s10, 128  }
  0xd2   : > { %1771 = vsyncadd (%p2074_p11), %s329_s10, 4294967168  ;;  %p2327_p12 = scmp.ne.s32.totalorder %s2313_s8, 0 }
  0xd4   : > { %1773 = dma.done.wait (%p2327_p12), [#allocation9], 32  }
  0xd5   : > { %1775 = vsyncadd (%p2327_p12), [#allocation9], 4294967264 }
  0xd6   : > { %1777 = dma.done.wait (%p2327_p12), [#allocation12], 272  }
  0xd7   : > { %1779 = vsyncadd (%p2327_p12), [#allocation12], 4294967024 }
  0xd8   : > { %1781 = dma.done.wait (%p2327_p12), [#allocation15], 272  }
  0xd9   : > { %1783 = vsyncadd (%p2327_p12), [#allocation15], 4294967024  ;;  %vm393_vm0 = vcmask 261120   ;;  %v392_v0 = vld [vmem:[%s332_s11] sm:$0xff]  ;;  %v1496_v7 = vld [vmem:[#allocation11] sm:$0xff]   ;;  %v1821_v8 = vmov 0.0  }
  0xda   : > { %v394_v1 = vsel %vm393_vm0, %v392_v0, 0.0  ;;  %1291 = vmatprep.subr.bf16.mxu0 %v1821_v8  ;;  %vm1822_vm1 = vmmov 0   ;;  %v1497_v9 = vld [vmem:[#allocation11 + $0x8] sm:$0xff]   ;;  %1299 = vmatprep.subr.bf16.mxu1 %v1821_v8  ;;  %v1245_v14 = vld [vmem:[#allocation8] ss:$0 sm:$0xff]  ;;  %vm492_vm2 = vcmask 60416  }
  0xdb   : > { %395 = vadd.xlane.f32.xlu0 %v394_v1  ;;  %1295 = vmatprep.mubr.msk.bf16.mxu0 %vm1822_vm1, %v1821_v8  ;;  %v1246_v16 = vld [vmem:[#allocation10] ss:$0 sm:$0xff]  ;;  %v1247_v20 = vld [vmem:[#allocation13] ss:$0 sm:$0xff]  ;;  %s1823_s8 = smov 80   ;;  %s1824_s9 = smov 96  }
  0xdc   : > { %1292 = vmatpush3.bf16.msra.mxu0 %v1496_v7  ;;  %1301 = vmatprep.mubr.msk.bf16.mxu1 %vm1822_vm1, %v1821_v8  ;;  %s1825_s18 = smov 88   ;;  %s1826_s19 = smov 120   ;;  %vm567_vm3 = vcmask 64512   ;;  %vm795_vm4 = vcmask 1043456   ;;  %vm998_vm5 = vcmask 130048   ;;  %vm1000_vm6 = vcmask 195584  }
  0xdd   : > { %1293 = vmatprep.subr.bf16.mxu0 %v1821_v8  ;;  %s1827_s22 = smov 72   ;;  %s1828_s14 = smov 112  }
  0xde   : > { %s1829_s17 = smov 104   ;;  %s1830_s23 = smov 64  }
  0xdf   : > { %s1831_s21 = smov 48   ;;  %s1832_s12 = smov 40  }
  0xe0   : > { %1294 = vmatpush3.bf16.msra.mxu0 %v1497_v9  ;;  %s1833_s15 = smov 56   ;;  %s1834_s10 = smov 16  }
  0xe1   : > { %1305 = vmatprep.subr.bf16.mxu0 %v1821_v8  ;;  %s1835_s11 = smov 8   ;;  %p2328_p0 = scmp.ne.s32.totalorder %s2323_s3, 0 }
 0x168   : > { %v396_v2 = vpop.xlane.xlu0 %395 }
 0x169   : > { %v398_v3 = vmul.f32 0.03125, %v396_v2 }
 0x16b   : > { %v399_v4 = vsub.f32 %v392_v0, %v398_v3 }
 0x16d   : > { %v400_v5 = vmul.f32 %v399_v4, %v399_v4 }
 0x16f   : > { %v401_v6 = vsel %vm393_vm0, %v400_v5, 0.0 }
 0x170   : > { %402 = vadd.xlane.f32.xlu0 %v401_v6 }
 0x1fd   : > { %v403_v10 = vpop.xlane.xlu0 %402 }
 0x1fe   : > { %v404_v11 = vmul.f32 0.03125, %v403_v10 }
 0x200   : > { %v405_v12 = vadd.f32 1e-05, %v404_v11 }
 0x202   : > { %1500 = vrsqrt.f32 %v405_v12 }
 0x20c   : > { %v1501_v13 = vpop.eup %1500 }
 0x20d   : > { %v407_v15 = vmul.f32 %v1501_v13, %v399_v4 }
 0x20f   : > { %v415_v17 = vmul.f32 %v1245_v14, %v407_v15 }
 0x211   : > { %v423_v18 = vadd.f32 %v1246_v16, %v415_v17 }
 0x213   : > { %v424_v19 = vpack.c.bf16 %v423_v18, %v423_v18 }
 0x215   : > { %1296 = vmatmul.mubr.msk.bf16.vlgmr.msra.gmra.mrb[0].mxu0 %vm393_vm0, %v424_v19 }
 0x216   : > { %1307 = vmatprep.mubr.msk.bf16.mxu0 %vm1822_vm1, %v1821_v8 }
 0x2e8   : > { %v485_v21 = vpop.f32.mrb[0].mxu0 }
 0x2e9   : > { %v486_v22 = vadd.f32 %v1247_v20, %v485_v21  ;;  %v1297_v23 = vpop.f32.mrb[1].mxu0 }
 0x2ea   : > { %v488_v24 = vpop.f32.mrb[2].mxu0 }
 0x2eb   : > { %v2168_v25 = vpack.c.bf16 %v486_v22, %v486_v22  ;;  %v1298_v26 = vpop.f32.mrb[3].mxu0 }
 0x2ed   : > { %525 = vrot.lane.b32.xlu0 %v2168_v25, %s1823_s8  ;;  %497 = vrot.lane.b32.xlu1 %v2168_v25, %s1824_s9  ;;  %493 = vst.msk [vmem:[#allocation2] sm:$0xf] %vm492_vm2, %v2168_v25  ;;  %s1836_s8 = smov 24   ;;  %s1265_s9 = sshll.u32 %s1802_s27, 7 }
 0x2ee   : > { %s1072_s27 = scalar_lea.sflag [#allocation7], %s2133_s1 }
 0x2f1   : > { %510 = vrot.lane.b32.xlu1 %v2168_v25, %s1825_s18  ;;  %s386_s18 = scalar_lea.vmem [#allocation17], %s1237_s16 }
 0x2f4   : > { %v555_v38 = vld [vmem:[#allocation2] sm:$0xf] }
 0x2f5   : > { %505 = vrot.lane.b32.xlu1 %v2168_v25, %s1826_s19  ;;  %s1086_s19 = sshll.u32 %s386_s18, 4  ;;  %s2250_s19 = int_to_ptr.vmem [resolvable:$true] %s1086_s19 }
 0x2f6   : > { %s1716_s16 = scalar_lea.vmem %s2250_s19, 128 }
 0x2f7   : > { %p1717_p11 = scmp.ne.s32.totalorder %s2250_s19, %s1716_s16 }
 0x2f9   : > { %540 = vrot.lane.b32.xlu1 %v2168_v25, %s1827_s22  ;;  %p1718_p5 = pnand %p1717_p11, %p2328_p0 }
 0x2fb   : > { %p1719_p7 = pneg %p1718_p5 }
 0x2fd   : > { %520 = vrot.lane.b32.xlu1 %v2168_v25, %s1828_s14 }
 0x301   : > { %535 = vrot.lane.b32.xlu1 %v2168_v25, %s1829_s17  ;;  %s2248_s17 = scalar_lea.hbm %s2305_s7, %s1265_s9 }
 0x305   : > { %501 = vrot.lane.b32.xlu1 %v2168_v25, %s1830_s23  ;;  %s1837_s23 = smov [#allocation17]  }
 0x35f   : > { %v526_v27 = vpop.permute.xlu0 %525  ;;  %v498_v28 = vpop.permute.xlu1 %497 }
 0x360   : > { %529 = vst.msk [vmem:[#allocation3 + $0x8] sm:$0xf] %vm492_vm2, %v526_v27  ;;  %500 = vst.msk [vmem:[#allocation3] sm:$0xf] %vm492_vm2, %v498_v28 }
 0x363   : > { %v511_v29 = vpop.permute.xlu1 %510 }
 0x364   : > { %514 = vst.msk [vmem:[#allocation3 + $0x4] sm:$0xf] %vm492_vm2, %v511_v29 }
 0x367   : > { %v506_v30 = vpop.permute.xlu1 %505  ;;  %v559_v31 = vld [vmem:[#allocation3] sm:$0xf]  ;;  %v561_v36 = vld [vmem:[#allocation3 + $0x8] sm:$0xf] }
 0x368   : > { %509 = vst.msk [vmem:[#allocation2 + $0x4] sm:$0xf] %vm492_vm2, %v506_v30  ;;  %v572_v32 = vsel %vm567_vm3, %v559_v31, 0  ;;  %v664_v39 = vsel %vm567_vm3, %v561_v36, 0 }
 0x369   : > { %1300 = vmatpush3.bf16.xpose.msra.mxu1 %v572_v32 }
 0x36a   : > { %1311 = vmatprep.subr.bf16.mxu1 %v1821_v8 }
 0x36b   : > { %v541_v33 = vpop.permute.xlu1 %540  ;;  %v560_v34 = vld [vmem:[#allocation3 + $0x4] sm:$0xf] }
 0x36c   : > { %544 = vst.msk [vmem:[#allocation3 + $0xc] sm:$0xf] %vm492_vm2, %v541_v33  ;;  %v618_v35 = vsel %vm567_vm3, %v560_v34, 0 }
 0x36d   : > { %1306 = vmatpush3.bf16.xpose.msra.mxu0 %v618_v35 }
 0x36e   : > { %1317 = vmatprep.subr.bf16.mxu0 %v1821_v8 }
 0x36f   : > { %v521_v37 = vpop.permute.xlu1 %520  ;;  %v556_v41 = vld [vmem:[#allocation2 + $0x4] sm:$0xf] }
 0x370   : > { %524 = vst.msk [vmem:[#allocation2 + $0x8] sm:$0xf] %vm492_vm2, %v521_v37  ;;  %1302 = vmatmul.mubr.msk.bf16.vlgmr.msra.gmra.mrb[0].mxu1 %vm567_vm3, %v555_v38 }
 0x371   : > { %1312 = vmatpush3.bf16.xpose.msra.mxu1 %v664_v39  ;;  %1313 = vmatprep.mubr.msk.bf16.mxu1 %vm1822_vm1, %v1821_v8 }
 0x372   : > { %1323 = vmatprep.subr.bf16.mxu1 %v1821_v8 }
 0x373   : > { %v536_v40 = vpop.permute.xlu1 %535  ;;  %v562_v42 = vld [vmem:[#allocation3 + $0xc] sm:$0xf] }
 0x374   : > { %539 = vst.msk [vmem:[#allocation2 + $0xc] sm:$0xf] %vm492_vm2, %v536_v40  ;;  %1308 = vmatmul.mubr.msk.bf16.vlgmr.msra.gmra.mrb[4].mxu0 %vm567_vm3, %v556_v41  ;;  %v710_v43 = vsel %vm567_vm3, %v562_v42, 0 }
 0x375   : > { %1318 = vmatpush3.bf16.xpose.msra.mxu0 %v710_v43  ;;  %1319 = vmatprep.mubr.msk.bf16.mxu0 %vm1822_vm1, %v1821_v8  ;;  %v1498_v43 = vld [vmem:[#allocation14] sm:$0xff]  }
 0x376   : > { %1329 = vmatprep.subr.bf16.mxu0 %v1821_v8 }
 0x377   : > { %v502_v44 = vpop.permute.xlu1 %501  ;;  %v557_v45 = vld [vmem:[#allocation2 + $0x8] sm:$0xf] }
 0x378   : > { %504 = vst.msk [vmem:[#allocation4] sm:$0xf] %vm492_vm2, %v502_v44  ;;  %1314 = vmatmul.mubr.msk.bf16.vlgmr.msra.gmra.mrb[4].mxu1 %vm567_vm3, %v557_v45 }
 0x379   : > { %1325 = vmatprep.mubr.msk.bf16.mxu1 %vm1822_vm1, %v1821_v8 }
 0x37b   : > { %v558_v46 = vld [vmem:[#allocation2 + $0xc] sm:$0xf] }
 0x37c   : > { %1320 = vmatmul.mubr.msk.bf16.vlgmr.msra.gmra.mrb[8].mxu0 %vm567_vm3, %v558_v46 }
 0x37d   : > { %1331 = vmatprep.mubr.msk.bf16.mxu0 %vm1822_vm1, %v1821_v8 }
 0x37f   : > { %v563_v47 = vld [vmem:[#allocation4] sm:$0xf] }
 0x380   : > { %v797_v48 = vsel %vm795_vm4, %v563_v47, 0  ;;  %v1499_v47 = vld [vmem:[#allocation14 + $0x8] sm:$0xff]  }
 0x381   : > { %1324 = vmatpush3.bf16.msra.mxu1 %v797_v48 }
 0x382   : > { %1335 = vmatprep.subr.bf16.mxu1 %v1821_v8 }
 0x443   : > { %v608_v49 = vpop.f32.mrb[0].mxu1 }
 0x444   : > { %v1303_v50 = vpop.f32.mrb[1].mxu1  ;;  %v752_v51 = vsel %vm567_vm3, %v608_v49, -inf }
 0x445   : > { %753 = vmax.xlane.f32.xlu1 %v752_v51  ;;  %v611_v52 = vpop.f32.mrb[2].mxu1 }
 0x446   : > { %v1304_v53 = vpop.f32.mrb[3].mxu1 }
 0x447   : > { %v654_v54 = vpop.f32.mrb[4].mxu0 }
 0x448   : > { %v1309_v55 = vpop.f32.mrb[5].mxu0  ;;  %v755_v56 = vsel %vm567_vm3, %v654_v54, -inf }
 0x449   : > { %756 = vmax.xlane.f32.xlu0 %v755_v56  ;;  %v657_v57 = vpop.f32.mrb[6].mxu0 }
 0x44a   : > { %v1310_v58 = vpop.f32.mrb[7].mxu0 }
 0x44b   : > { %v700_v59 = vpop.f32.mrb[4].mxu1 }
 0x44c   : > { %v1315_v60 = vpop.f32.mrb[5].mxu1  ;;  %v758_v61 = vsel %vm567_vm3, %v700_v59, -inf }
 0x44d   : > { %759 = vmax.xlane.f32.xlu1 %v758_v61  ;;  %v703_v62 = vpop.f32.mrb[6].mxu1 }
 0x44e   : > { %v1316_v63 = vpop.f32.mrb[7].mxu1 }
 0x44f   : > { %v746_v0 = vpop.f32.mrb[8].mxu0 }
 0x450   : > { %v1321_v1 = vpop.f32.mrb[9].mxu0  ;;  %v761_v2 = vsel %vm567_vm3, %v746_v0, -inf }
 0x451   : > { %762 = vmax.xlane.f32.xlu0 %v761_v2  ;;  %v749_v3 = vpop.f32.mrb[10].mxu0 }
 0x452   : > { %v1322_v4 = vpop.f32.mrb[11].mxu0 }
 0x45e   : > { %530 = vrot.lane.b32.xlu1 %v2168_v25, %s1831_s21  ;;  %s1720_s21 = sshll.u32 %s1837_s23, 4  ;;  %s1721_s21 = int_to_ptr.vmem [resolvable:$false] %s1720_s21 }
 0x45f   : > { %p1723_p10 = scmp.lt.s32.totalorder %s2250_s19, %s1721_s21 }
 0x462   : > { %545 = vrot.lane.b32.xlu1 %v2168_v25, %s1832_s12  ;;  %s1722_s12 = scalar_lea.vmem %s1721_s21, 256 }
 0x463   : > { %p1724_p13 = scmp.lt.s32.totalorder %s1722_s12, %s1716_s16 }
 0x465   : > { %p1725_p2 = por %p1724_p13, %p1723_p10 }
 0x467   : > { %515 = vrot.lane.b32.xlu0 %v2168_v25, %s1833_s15  ;;  %p1726_p8 = pnand %p1725_p2, %p1719_p7 }
 0x4d2   : > { %v754_v5 = vpop.xlane.xlu1 %753 }
 0x4d3   : > { %v764_v6 = vsub.f32 %v608_v49, %v754_v5 }
 0x4d5   : > { %v768_v7 = vmul.f32 1.442695, %v764_v6 }
 0x4d6   : > { %v757_v9 = vpop.xlane.xlu0 %756 }
 0x4d7   : > { %1502 = vpow2.f32 %v768_v7  ;;  %v765_v10 = vsub.f32 %v654_v54, %v757_v9 }
 0x4d9   : > { %v770_v11 = vmul.f32 1.442695, %v765_v10 }
 0x4da   : > { %v760_v12 = vpop.xlane.xlu1 %759 }
 0x4db   : > { %1504 = vpow2.f32 %v770_v11  ;;  %v766_v13 = vsub.f32 %v700_v59, %v760_v12  ;;  %v1260_v12 = vld [vmem:[#allocation16] ss:$0 sm:$0xff] }
 0x4dd   : > { %v772_v14 = vmul.f32 1.442695, %v766_v13 }
 0x4de   : > { %v531_v15 = vpop.permute.xlu1 %530  ;;  %v763_v16 = vpop.xlane.xlu0 %762 }
 0x4df   : > { %1506 = vpow2.f32 %v772_v14  ;;  %534 = vst.msk [vmem:[#allocation4 + $0x8] sm:$0xf] %vm492_vm2, %v531_v15  ;;  %v767_v17 = vsub.f32 %v746_v0, %v763_v16 }
 0x4e1   : > { %v1503_v18 = vpop.eup %1502  ;;  %v774_v19 = vmul.f32 1.442695, %v767_v17 }
 0x4e2   : > { %v546_v20 = vpop.permute.xlu1 %545  ;;  %v516_v21 = vpop.permute.xlu0 %515  ;;  %v788_v22 = vpack.c.bf16 %v1503_v18, %v1503_v18  ;;  %v776_v37 = vsel %vm567_vm3, %v1503_v18, 0.0 }
 0x4e3   : > { %1508 = vpow2.f32 %v774_v19  ;;  %549 = vst.msk [vmem:[#allocation4 + $0xc] sm:$0xf] %vm492_vm2, %v546_v20  ;;  %519 = vst.msk [vmem:[#allocation4 + $0x4] sm:$0xf] %vm492_vm2, %v516_v21 }
 0x4e4   : > { %1326 = vmatmul.mubr.msk.bf16.vlgmr.msra.gmra.mrb[8].mxu1 %vm567_vm3, %v788_v22 }
 0x4e5   : > { %v1505_v23 = vpop.eup %1504  ;;  %1337 = vmatprep.mubr.msk.bf16.mxu1 %vm1822_vm1, %v1821_v8 }
 0x4e6   : > { %v779_v24 = vsel %vm567_vm3, %v1505_v23, 0.0  ;;  %v565_v25 = vld [vmem:[#allocation4 + $0x8] sm:$0xf]  ;;  %v789_v34 = vpack.c.bf16 %v1505_v23, %v1505_v23 }
 0x4e7   : > { %780 = vadd.xlane.f32.xlu0 %v779_v24  ;;  %v889_v26 = vsel %vm795_vm4, %v565_v25, 0 }
 0x4e8   : > { %1336 = vmatpush3.bf16.msra.mxu1 %v889_v26 }
 0x4e9   : > { %v1507_v27 = vpop.eup %1506  ;;  %1347 = vmatprep.subr.bf16.mxu1 %v1821_v8 }
 0x4ea   : > { %v782_v28 = vsel %vm567_vm3, %v1507_v27, 0.0  ;;  %v564_v29 = vld [vmem:[#allocation4 + $0x4] sm:$0xf]  ;;  %v790_v30 = vpack.c.bf16 %v1507_v27, %v1507_v27  ;;  %v566_v32 = vld [vmem:[#allocation4 + $0xc] sm:$0xf] }
 0x4eb   : > { %783 = vadd.xlane.f32.xlu1 %v782_v28  ;;  %v843_v31 = vsel %vm795_vm4, %v564_v29, 0  ;;  %v935_v36 = vsel %vm795_vm4, %v566_v32, 0 }
 0x4ec   : > { %1330 = vmatpush3.bf16.msra.mxu0 %v843_v31  ;;  %1338 = vmatmul.mubr.msk.bf16.vlgmr.msra.gmra.mrb[12].mxu1 %vm567_vm3, %v790_v30 }
 0x4ed   : > { %v1509_v33 = vpop.eup %1508  ;;  %1341 = vmatprep.subr.bf16.mxu0 %v1821_v8  ;;  %1351 = vmatprep.mubr.msk.bf16.mxu1 %vm1822_vm1, %v1821_v8 }
 0x4ee   : > { %v785_v35 = vsel %vm567_vm3, %v1509_v33, 0.0  ;;  %v791_v38 = vpack.c.bf16 %v1509_v33, %v1509_v33  ;;  %1348 = vmatpush3.bf16.msra.mxu1 %v1498_v43 }
 0x4ef   : > { %786 = vadd.xlane.f32.xlu0 %v785_v35  ;;  %1332 = vmatmul.mubr.msk.bf16.vlgmr.msra.gmra.mrb[12].mxu0 %vm567_vm3, %v789_v34 }
 0x4f0   : > { %1342 = vmatpush3.bf16.msra.mxu0 %v935_v36  ;;  %1343 = vmatprep.mubr.msk.bf16.mxu0 %vm1822_vm1, %v1821_v8 }
 0x4f1   : > { %1349 = vmatprep.subr.bf16.mxu1 %v1821_v8 }
 0x4f2   : > { %1350 = vmatpush3.bf16.msra.mxu1 %v1499_v47 }
 0x4f3   : > { %777 = vadd.xlane.f32.xlu0 %v776_v37 }
 0x4f7   : > { %1344 = vmatmul.mubr.msk.bf16.vlgmr.msra.gmra.mrb[16].mxu0 %vm567_vm3, %v791_v38 }
 0x574   : > { %v781_v40 = vpop.xlane.xlu0 %780 }
 0x578   : > { %v784_v39 = vpop.xlane.xlu1 %783 }
 0x579   : > { %1510 = vrcp.f32 %v784_v39 }
 0x57a   : > { %1512 = vrcp.f32 %v781_v40 }
 0x57c   : > { %v787_v46 = vpop.xlane.xlu0 %786 }
 0x57d   : > { %1514 = vrcp.f32 %v787_v46 }
 0x580   : > { %v778_v1 = vpop.xlane.xlu0 %777 }
 0x581   : > { %1516 = vrcp.f32 %v778_v1 }
 0x583   : > { %v1511_v48 = vpop.eup %1510 }
 0x584   : > { %v1513_v53 = vpop.eup %1512 }
 0x587   : > { %v1515_v59 = vpop.eup %1514 }
 0x58b   : > { %v1517_v2 = vpop.eup %1516 }
 0x5b7   : > { %v833_v41 = vpop.f32.mrb[8].mxu1 }
 0x5b8   : > { %v1327_v42 = vpop.f32.mrb[9].mxu1  ;;  %v981_v4 = vmul.f32 %v1517_v2, %v833_v41 }
 0x5b9   : > { %v836_v44 = vpop.f32.mrb[10].mxu1 }
 0x5ba   : > { %v1328_v45 = vpop.f32.mrb[11].mxu1 }
 0x5bf   : > { %v925_v49 = vpop.f32.mrb[12].mxu1 }
 0x5c0   : > { %v983_v50 = vmul.f32 %v1511_v48, %v925_v49  ;;  %v1339_v51 = vpop.f32.mrb[13].mxu1 }
 0x5c1   : > { %v928_v52 = vpop.f32.mrb[14].mxu1 }
 0x5c2   : > { %v1340_v54 = vpop.f32.mrb[15].mxu1  ;;  %990 = vrot.lane.b32.xlu0 %v983_v50, %s1834_s10  ;;  %v879_v55 = vpop.f32.mrb[12].mxu0 }
 0x5c3   : > { %v982_v56 = vmul.f32 %v1513_v53, %v879_v55  ;;  %v1333_v57 = vpop.f32.mrb[13].mxu0 }
 0x5c4   : > { %v882_v58 = vpop.f32.mrb[14].mxu0 }
 0x5c5   : > { %986 = vrot.lane.b32.xlu1 %v982_v56, %s1835_s11  ;;  %v1334_v8 = vpop.f32.mrb[15].mxu0 }
 0x5ca   : > { %v971_v60 = vpop.f32.mrb[16].mxu0 }
 0x5cb   : > { %v984_v61 = vmul.f32 %v1515_v59, %v971_v60  ;;  %v1345_v62 = vpop.f32.mrb[17].mxu0 }
 0x5cc   : > { %v974_v63 = vpop.f32.mrb[18].mxu0 }
 0x5cd   : > { %994 = vrot.lane.b32.xlu1 %v984_v61, %s1836_s8  ;;  %v1346_v0 = vpop.f32.mrb[19].mxu0 }
 0x634   : > { %v991_v6 = vpop.permute.xlu0 %990 }
 0x637   : > { %v987_v3 = vpop.permute.xlu1 %986 }
 0x638   : > { %v997_v5 = vsel %vm567_vm3, %v981_v4, %v987_v3 }
 0x639   : > { %v999_v7 = vsel %vm998_vm5, %v997_v5, %v991_v6 }
 0x63f   : > { %v995_v9 = vpop.permute.xlu1 %994 }
 0x640   : > { %v1001_v10 = vsel %vm1000_vm6, %v999_v7, %v995_v9 }
 0x641   : > { %v1002_v11 = vpack.c.bf16 %v1001_v10, %v1001_v10 }
 0x643   : > { %1352 = vmatmul.mubr.msk.bf16.vlgmr.msra.gmra.mrb[16].mxu1 %vm393_vm0, %v1002_v11 }
 0x716   : > { %v1064_v13 = vpop.f32.mrb[16].mxu1 }
 0x717   : > { %v1065_v14 = vadd.f32 %v1260_v12, %v1064_v13  ;;  %v1353_v15 = vpop.f32.mrb[17].mxu1 }
 0x718   : > { %v1067_v16 = vpop.f32.mrb[18].mxu1 }
 0x719   : > { %v1354_v17 = vpop.f32.mrb[19].mxu1  ;;  %1070 = vst.msk [vmem:[%s386_s18] sm:$0xff] %vm393_vm0, %v1065_v14 }
 0x71a   : > { %1729 = shalt.err (!%p1726_p8)
}
 0x71b   : > { %s1730_s1 = scalar_lea.hbm %s2248_s17, 128  ;;  %s1734_s11 = scalar_lea.hbm %s2305_s7, 256 }
 0x71c   : > { %p1731_p9 = scmp.ne.s32.totalorder %s2248_s17, %s1730_s1  ;;  %p1735_p3 = scmp.lt.u32.totalorder %s2248_s17, %s2305_s7 }
 0x71d   : > { %p1736_p1 = scmp.lt.u32.totalorder %s1734_s11, %s1730_s1  ;;  %p1738_p11 = scmp.lt.u32.totalorder %s1730_s1, %s2248_s17 }
 0x71e   : > { %p1732_p4 = pnand %p1731_p9, %p2328_p0 }
 0x71f   : > { %p1737_p12 = por %p1736_p1, %p1735_p3 }
 0x720   : > { %p1733_p6 = pneg %p1732_p4 }
 0x721   : > { %p1739_p5 = por %p1738_p11, %p1737_p12 }
 0x723   : > { %p1740_p7 = pnand %p1739_p5, %p1733_p6 }
 0x725   : > { %1743 = shalt.err (!%p1740_p7)
}
 0x726   : > { %1381 = dma.vmem_to_hbm [thread:$0]  (%p2328_p0), %s2250_s19, 128, %s2248_s17, %s1072_s27  }
 0x727 PF: > { %s1098_s18 = sand.u32 1, %s1790_s24   ;;  %p2329_p10 = scmp.ne.s32.totalorder %s2324_s30, 0 }
 0x728   : > { %p2330_p13 = scmp.ge.s32.totalorder %s1810_s29, 2  ;;  %s1099_s22 = scalar_lea.sflag [#allocation7], %s1098_s18 }
 0x72a   : > { %p1407_p2 = pnand %p2330_p13, %p2329_p10 }
 0x72c   : > { %1785 = dma.done.wait (!%p1407_p2), %s1099_s22, 128  }
 0x72d   : > { %1787 = vsyncadd (!%p1407_p2), %s1099_s22, 4294967168  ;;  %s26_s29 = sadd.s32 1, %s1810_s29   ;;  %s2331_s24 = smov %s1794_s25 }
 0x72e   : > { %p23_p8 = scmp.ge.s32.totalorder %s26_s29, 4   ;;  %s2332_s25 = smov %s1798_s26 }
 0x72f   : > { %s2333_s26 = smov %s2083_s20  ;;  %s2334_s27 = smov %s1806_s28 }
 0x730   : > { %s2335_s28 = smov %s2337_s13  ;;  %25 = sbr.rel (!%p23_p8) target bundleno = 12 (0xc), region = 131 }
 0x737   :  { %1104 = vsyncpa [#allocation6], 1 }
 0x738   :  { %1106 = vsyncpa [#allocation6 + $0x1], 1 }
 0x739   :  { %1107 = vsyncpa [#allocation9], 1 }
 0x73a   :  { %1108 = vsyncpa [#allocation12], 1 }
 0x73b   :  { %1109 = vsyncpa [#allocation15], 1 }
 0x73c   :  { %1110 = vsyncpa [#allocation7], 1 }
 0x73d   :  { %1112 = vsyncpa [#allocation7 + $0x1], 1 }

</bundles_post_ra>
